<compile_context>
chip_gen: v7x
topology: tpu7x:2x2x1
jax: 0.10.0
libtpu: 0.0.40
codegen_flags: <defaults>
</compile_context>

<pallas_src>
import numpy as np
import jax
import jax.numpy as jnp
from jax import lax
from jax.experimental import pallas as pl
from jax.experimental.pallas import tpu as pltpu

NUM_CLASS = 45
DIM = 512
NUM_HEADS = 4            # MIEN passes h=4 into TransformerBlock
MLP_RATIO = 4.0
HIDDEN = int(DIM * MLP_RATIO)


def _vmem_limit_bytes():
    """~half of physical VMEM: 32 MiB on v7x (64 MiB/TC), 64 MiB on v5e/v6e."""
    try:
        phys = int(pltpu.get_tpu_info().vmem_capacity_bytes)
    except Exception:
        return 32 * 1024 * 1024
    return max(32 * 1024 * 1024, min(phys // 2, 96 * 1024 * 1024))


# --------------------------------------------------------------------------- #
# Pallas kernel: tiled (M,K)@(K,N) + bias  (1x1 convs and Linear fc)           #
# --------------------------------------------------------------------------- #
def _linear_kernel(x_ref, w_ref, b_ref, o_ref):
    o_ref[...] = (jnp.dot(x_ref[...], w_ref[...],
                          preferred_element_type=jnp.float32) + b_ref[...])


def pallas_linear(x2d, w, b):
    """x2d: (M, K) f32, w: (K, N) f32, b: (N,) -> (M, N) f32 (bf16 MXU inputs)."""
    M, K = x2d.shape
    N = w.shape[1]
    tm = min(M, 512)
    grid_m = pl.cdiv(M, tm)
    xb = x2d.astype(jnp.bfloat16)
    wb = w.astype(jnp.bfloat16)
    b2 = b.reshape(1, N).astype(jnp.float32)
    return pl.pallas_call(
        _linear_kernel,
        out_shape=jax.ShapeDtypeStruct((M, N), jnp.float32),
        grid=(grid_m,),
        in_specs=[pl.BlockSpec((tm, K), lambda i: (i, 0)),
                  pl.BlockSpec((K, N), lambda i: (0, 0)),
                  pl.BlockSpec((1, N), lambda i: (0, 0))],
        out_specs=pl.BlockSpec((tm, N), lambda i: (i, 0)),
        compiler_params=pltpu.CompilerParams(dimension_semantics=("parallel",)),
    )(xb, wb, b2)


# --------------------------------------------------------------------------- #
# Pallas kernel: l2 normalization over channels (rows x lanes=C)               #
# --------------------------------------------------------------------------- #
def _l2norm_kernel(x_ref, o_ref):
    x = x_ref[...]
    ssq = jnp.sum(x * x, axis=-1, keepdims=True)
    # single EUP rsqrt; matches x / (||x|| + 1e-8) to ~1e-8 relative
    o_ref[...] = x * lax.rsqrt(ssq + 1e-12)


def pallas_l2norm_rows(x2d):
    M, C = x2d.shape
    return pl.pallas_call(
        _l2norm_kernel,
        out_shape=jax.ShapeDtypeStruct((M, C), jnp.float32),
        grid=(1,),
        in_specs=[pl.BlockSpec((M, C), lambda i: (0, 0))],
        out_specs=pl.BlockSpec((M, C), lambda i: (0, 0)),
    )(x2d)


# --------------------------------------------------------------------------- #
# Pallas kernel: one full TransformerBlock (attention with CIM + MLP)          #
# --------------------------------------------------------------------------- #
def pallas_transformer_block(x, tp):
    """x: (B, N, C) f32 tokens -> (B, N, C) f32."""
    B, N, C = x.shape
    H = NUM_HEADS
    HD = C // H
    scale = HD ** (-0.5)
    n_valid = N
    Npad = ((N + 127) // 128) * 128                 # lane-dense token dim (196 -> 256)

    # CIM (bias-free 1x1 convs over stacked per-head attention logits) is a linear
    # mix of the PRE-softmax scores:  attn'_i = sum_j mix[i,j]*scale * q_j k_j^T.
    # Fold mix*scale into the Q side as one (H, C) column-scale table.
    mix_rows = jnp.asarray(
        np.repeat(np.asarray(tp["mix"], np.float32) * scale, HD, axis=1))   # (H, C)

    def kernel(x_ref, mix_ref, ln1g_ref, ln1b_ref, wqkv_ref, wproj_ref, bproj_ref,
               ln2g_ref, ln2b_ref, w1_ref, b1_ref, w2_ref, b2_ref, o_ref):
        x0 = x_ref[...]                                        # (Npad, C) f32

        def layer_norm(v, g_ref, b_ref):
            mu = jnp.mean(v, axis=-1, keepdims=True)
            var = jnp.mean(jnp.square(v - mu), axis=-1, keepdims=True)
            return (v - mu) * lax.rsqrt(var + 1e-5) * g_ref[...] + b_ref[...]

        # ---------------- attention (CIM + scale folded into Q) ----------------
        xn = layer_norm(x0, ln1g_ref, ln1b_ref)
        qkv = jnp.dot(xn.astype(jnp.bfloat16), wqkv_ref[...],
                      preferred_element_type=jnp.float32)       # (Npad, 3C)
        q = qkv[:, :C]
        kT = jnp.transpose(qkv[:, C:2 * C]).astype(jnp.bfloat16)   # (C, Npad), ONE transpose
        v = qkv[:, 2 * C:]

        # additive mask on padded key columns, broadcast from a single row
        col_ids = lax.broadcasted_iota(jnp.int32, (1, Npad), 1)
        key_bias = jnp.where(col_ids < n_valid, 0.0, -1e9)      # (1, Npad)

        mix_all = mix_ref[...]                                  # (H, C) = mix*scale repeated
        head_out = []
        for i in range(H):
            qm = (q * mix_all[i:i + 1, :]).astype(jnp.bfloat16)          # (Npad, C)
            a = jnp.dot(qm, kT, preferred_element_type=jnp.float32) + key_bias
            a = a - jnp.max(a, axis=-1, keepdims=True)
            e = jnp.exp(a)
            p = e * pl.reciprocal(jnp.sum(e, axis=-1, keepdims=True), approx=True)
            vi = v[:, i * HD:(i + 1) * HD].astype(jnp.bfloat16)
            head_out.append(jnp.dot(p.astype(jnp.bfloat16), vi,
                                    preferred_element_type=jnp.float32))
        attn_out = jnp.concatenate(head_out, axis=-1)           # (Npad, C)
        attn_out = jnp.dot(attn_out.astype(jnp.bfloat16), wproj_ref[...],
                           preferred_element_type=jnp.float32) + bproj_ref[...]
        x1 = x0 + attn_out

        # ---------------- MLP (tanh-approx GELU -> EUP) ----------------
        xn2 = layer_norm(x1, ln2g_ref, ln2b_ref)
        hdn = jnp.dot(xn2.astype(jnp.bfloat16), w1_ref[...],
                      preferred_element_type=jnp.float32) + b1_ref[...]
        c = float(np.sqrt(2.0 / np.pi))
        hdn = 0.5 * hdn * (1.0 + jnp.tanh(c * (hdn + 0.044715 * hdn * hdn * hdn)))
        mlp = jnp.dot(hdn.astype(jnp.bfloat16), w2_ref[...],
                      preferred_element_type=jnp.float32) + b2_ref[...]
        o_ref[...] = x1 + mlp

    # weight operands (big matmul weights in bf16, norms/biases/mix in f32)
    weights = [
        mix_rows,
        tp["ln1_g"], tp["ln1_b"],
        tp["wqkv"].astype(jnp.bfloat16),
        tp["wproj"].astype(jnp.bfloat16), tp["bproj"],
        tp["ln2_g"], tp["ln2_b"],
        tp["w1"].astype(jnp.bfloat16), tp["b1"],
        tp["w2"].astype(jnp.bfloat16), tp["b2"],
    ]

    xpad = jnp.pad(x, ((0, 0), (0, Npad - N), (0, 0)))

    def build_and_run(single_buffer_weights):
        def wspec(shape):
            kw = {}
            if single_buffer_weights:
                # grid-invariant weights: one VMEM buffer instead of two
                kw["pipeline_mode"] = pl.Buffered(1)
            return pl.BlockSpec(shape, lambda b: tuple(0 for _ in shape), **kw)

        in_specs = [pl.BlockSpec((None, Npad, C), lambda b: (b, 0, 0))]
        in_specs += [wspec(w.shape) for w in weights]

        return pl.pallas_call(
            kernel,
            out_shape=jax.ShapeDtypeStruct((B, Npad, C), jnp.float32),
            grid=(B,),
            in_specs=in_specs,
            out_specs=pl.BlockSpec((None, Npad, C), lambda b: (b, 0, 0)),
            compiler_params=pltpu.CompilerParams(
                dimension_semantics=("parallel",),       # megacore-shard batch
                vmem_limit_bytes=_vmem_limit_bytes()),
        )(xpad, *weights)

    try:
        out = jax.block_until_ready(build_and_run(True))
    except Exception:
        # pipeline_mode / pl.Buffered unsupported on this jax version -> default specs
        out = build_and_run(False)
    return out[:, :N, :]


# --------------------------------------------------------------------------- #
# Plain-JAX glue: resnet18 backbone (deterministic init, eval-mode BN)         #
# --------------------------------------------------------------------------- #
def _conv2d(x, w, stride, pad):
    return lax.conv_general_dilated(
        x, w, (stride, stride), ((pad, pad), (pad, pad)),
        dimension_numbers=("NCHW", "OIHW", "NCHW"))


def _bn(x, p):
    inv = p["g"] / jnp.sqrt(p["v"] + 1e-5)
    return x * inv[None, :, None, None] + (p["b"] - p["m"] * inv)[None, :, None, None]


def _maxpool3x3s2(x):
    return lax.reduce_window(x, -jnp.inf, lax.max, (1, 1, 3, 3), (1, 1, 2, 2),
                             ((0, 0), (0, 0), (1, 1), (1, 1)))


def _init_conv(key, out_c, in_c, k):
    scale = 1.0 / np.sqrt(in_c * k * k)
    return jax.random.normal(key, (out_c, in_c, k, k), jnp.float32) * scale


def _bn_params(c):
    return dict(g=jnp.ones((c,), jnp.float32), b=jnp.zeros((c,), jnp.float32),
                m=jnp.zeros((c,), jnp.float32), v=jnp.ones((c,), jnp.float32))


def make_resnet18_params(key):
    keys = iter(jax.random.split(key, 32))
    p = {"conv1": _init_conv(next(keys), 64, 3, 7), "bn1": _bn_params(64)}

    def block(in_c, out_c, stride):
        d = dict(conv1=_init_conv(next(keys), out_c, in_c, 3), bn1=_bn_params(out_c),
                 conv2=_init_conv(next(keys), out_c, out_c, 3), bn2=_bn_params(out_c),
                 stride=stride)
        if stride != 1 or in_c != out_c:
            d["down_conv"] = _init_conv(next(keys), out_c, in_c, 1)
            d["down_bn"] = _bn_params(out_c)
        return d

    cfg = [(64, 64, 1), (64, 64, 1), (64, 128, 2), (128, 128, 1),
           (128, 256, 2), (256, 256, 1), (256, 512, 2), (512, 512, 1)]
    p["blocks"] = [block(i, o, s) for i, o, s in cfg]
    return p


def resnet18_features(p, x):
    x = jax.nn.relu(_bn(_conv2d(x, p["conv1"], 2, 3), p["bn1"]))
    x = _maxpool3x3s2(x)
    feats = []
    for i, blk in enumerate(p["blocks"]):
        idn = x
        out = jax.nn.relu(_bn(_conv2d(x, blk["conv1"], blk["stride"], 1), blk["bn1"]))
        out = _bn(_conv2d(out, blk["conv2"], 1, 1), blk["bn2"])
        if "down_conv" in blk:
            idn = _bn(_conv2d(x, blk["down_conv"], blk["stride"], 0), blk["down_bn"])
        x = jax.nn.relu(out + idn)
        if i % 2 == 1:
            feats.append(x)          # end of layer1 / layer2 / layer3 / layer4
    return feats                      # f1 (64ch), f2 (128ch), f3 (256ch), f4 (512ch)


# --------------------------------------------------------------------------- #
# Parameter construction for MIEN                                              #
# --------------------------------------------------------------------------- #
def _init_linear(key, fan_in, fan_out):
    k1, k2 = jax.random.split(key)
    lim = 1.0 / np.sqrt(fan_in)
    w = jax.random.uniform(k1, (fan_in, fan_out), jnp.float32, -lim, lim)
    b = jax.random.uniform(k2, (fan_out,), jnp.float32, -lim, lim)
    return w, b


def make_mien_params(key):
    ks = jax.random.split(key, 12)
    p = {"backbone": make_resnet18_params(ks[0])}
    p["conv11_w"], p["conv11_b"] = _init_linear(ks[1], 64, 512)
    p["conv22_w"], p["conv22_b"] = _init_linear(ks[2], 128, 512)
    p["conv33_w"], p["conv33_b"] = _init_linear(ks[3], 256, 512)

    wqkv, _ = _init_linear(ks[4], DIM, 3 * DIM)          # qkv_bias=False
    wproj, bproj = _init_linear(ks[5], DIM, DIM)
    w1, b1 = _init_linear(ks[6], DIM, HIDDEN)
    w2, b2 = _init_linear(ks[7], HIDDEN, DIM)

    # CIM weights: convMain[i] is Conv2d(1,1,1,bias=False); convRest[i] is Conv2d(H-1,1,1,bias=False)
    wmain = np.asarray(jax.random.uniform(ks[8], (NUM_HEADS,), jnp.float32, -1.0, 1.0))
    lim = 1.0 / np.sqrt(NUM_HEADS - 1)
    wrest = np.asarray(jax.random.uniform(ks[9], (NUM_HEADS, NUM_HEADS - 1),
                                          jnp.float32, -lim, lim))
    mix = np.zeros((NUM_HEADS, NUM_HEADS), np.float32)
    for i in range(NUM_HEADS):
        mix[i, i] = wmain[i]
        others = [j for j in range(NUM_HEADS) if j != i]
        for pos, j in enumerate(others):
            mix[i, j] = wrest[i, pos]

    p["tblock"] = dict(
        ln1_g=jnp.ones((1, DIM), jnp.float32), ln1_b=jnp.zeros((1, DIM), jnp.float32),
        wqkv=wqkv, wproj=wproj, bproj=bproj.reshape(1, DIM),
        ln2_g=jnp.ones((1, DIM), jnp.float32), ln2_b=jnp.zeros((1, DIM), jnp.float32),
        w1=w1, b1=b1.reshape(1, HIDDEN), w2=w2, b2=b2.reshape(1, DIM),
        mix=mix)

    p["fc_w"], p["fc_b"] = _init_linear(ks[10], DIM + DIM, NUM_CLASS)
    return p


# --------------------------------------------------------------------------- #
# MIEN forward                                                                 #
# --------------------------------------------------------------------------- #
def _adaptive_avgpool(f, out_hw):
    B, C, Hh, Ww = f.shape
    kh, kw = Hh // out_hw, Ww // out_hw
    return f.reshape(B, C, out_hw, kh, out_hw, kw).mean(axis=(3, 5))


def mien_forward(params, x):
    f1, f2, f3, f4 = resnet18_features(params["backbone"], x)
    B = x.shape[0]

    # AdaptiveAvgPool2d((7,7)) commutes exactly with a 1x1 conv (+bias): pool FIRST
    # so the pointwise conv runs on 49 rows/image instead of 3136/784/196.
    def reduce_branch(f, w, b):
        fp = _adaptive_avgpool(f, 7)                          # (B, Cin, 7, 7)
        rows = fp.transpose(0, 2, 3, 1).reshape(B * 49, -1)   # channels-last rows
        return pallas_linear(rows, w, b)                      # (B*49, 512)

    r1 = reduce_branch(f1, params["conv11_w"], params["conv11_b"])
    r2 = reduce_branch(f2, params["conv22_w"], params["conv22_b"])
    r3 = reduce_branch(f3, params["conv33_w"], params["conv33_b"])
    r4 = f4.transpose(0, 2, 3, 1).reshape(B * 49, DIM)        # layer4 is already 7x7

    # single fused l2-normalisation (over channels) for all four branches
    normed = pallas_l2norm_rows(jnp.concatenate([r1, r2, r3, r4], axis=0))
    g1, g2, g3, g4 = [t.reshape(B, 7, 7, DIM) for t in jnp.split(normed, 4, axis=0)]

    # channels-last 14x14 mosaic: rows 0-6 = [f1 | f3], rows 7-13 = [f2 | f4]
    top = jnp.concatenate([g1, g3], axis=2)                   # (B, 7, 14, C)
    bot = jnp.concatenate([g2, g4], axis=2)                   # (B, 7, 14, C)
    tokens = jnp.concatenate([top, bot], axis=1).reshape(B, 14 * 14, DIM)

    tokens = pallas_transformer_block(tokens, params["tblock"])

    fvec = tokens.mean(axis=1)                                # AdaptiveAvgPool2d((1,1))+flatten
    xvec = f4.mean(axis=(2, 3))                               # backbone.avgpool on raw layer4
    feat = jnp.concatenate((xvec, fvec), axis=1)              # (B, 1024)
    return pallas_linear(feat, params["fc_w"], params["fc_b"])


# --------------------------------------------------------------------------- #
if __name__ == "__main__":
    key = jax.random.PRNGKey(0)
    pkey, xkey = jax.random.split(key)
    params = make_mien_params(pkey)

    # Input must be 224x224 so that layer4's output is 7x7 (required by the mosaic concat).
    x = jax.random.normal(xkey, (2, 3, 224, 224), jnp.float32)

    logits = mien_forward(params, x)
    logits = jax.block_until_ready(logits)
    assert logits.shape == (2, NUM_CLASS), logits.shape
    assert bool(jnp.all(jnp.isfinite(logits)))
    print("KERNEL_OK")
</pallas_src>

<mosaic_0001>
module attributes {stable_mosaic.version = 11 : i64} {
  func.func @_linear_kernel(%arg0: i32, %arg1: memref<98x64xbf16, #tpu.memory_space<vmem>>, %arg2: memref<64x512xbf16, #tpu.memory_space<vmem>>, %arg3: memref<1x512xf32, #tpu.memory_space<vmem>>, %arg4: memref<98x512xf32, #tpu.memory_space<vmem>>) attributes {dimension_semantics = [#tpu.dimension_semantics<parallel>], iteration_bounds = array<i64: 1>, scalar_prefetch = 0 : i64, scratch_operands = 0 : i64, tpu.core_type = #tpu.core_type<tc>, window_params = [{transform_indices = @transform_0, window_bounds = array<i64: 98, 64>}, {pipeline_mode = #tpu.pipeline_mode<synchronous>, transform_indices = @transform_1, window_bounds = array<i64: 64, 512>}, {pipeline_mode = #tpu.pipeline_mode<synchronous>, transform_indices = @transform_2, window_bounds = array<i64: 1, 512>}, {transform_indices = @transform_3, window_bounds = array<i64: 98, 512>}]} {
    %c0 = arith.constant 0 : index
    %c0_0 = arith.constant 0 : index
    %0 = vector.load %arg1[%c0, %c0_0] : memref<98x64xbf16, #tpu.memory_space<vmem>>, vector<98x64xbf16>
    %c0_1 = arith.constant 0 : index
    %c0_2 = arith.constant 0 : index
    %1 = vector.load %arg2[%c0_1, %c0_2] : memref<64x512xbf16, #tpu.memory_space<vmem>>, vector<64x512xbf16>
    %cst = arith.constant dense<0.000000e+00> : vector<98x512xf32>
    %2 = tpu.matmul %0, %1, %cst {dimension_numbers = #tpu.dot_dimension_numbers<[1], [0], [0], [1], [0, 0, 1, 1], [], []>} : vector<98x64xbf16>, vector<64x512xbf16>, vector<98x512xf32> -> vector<98x512xf32>
    %c0_3 = arith.constant 0 : index
    %c0_4 = arith.constant 0 : index
    %3 = vector.load %arg3[%c0_3, %c0_4] : memref<1x512xf32, #tpu.memory_space<vmem>>, vector<1x512xf32>
    %4 = vector.broadcast %3 : vector<1x512xf32> to vector<98x512xf32>
    %5 = arith.addf %2, %4 : vector<98x512xf32>
    %c0_5 = arith.constant 0 : index
    %c0_6 = arith.constant 0 : index
    %6 = vector.load %arg4[%c0_5, %c0_6] : memref<98x512xf32, #tpu.memory_space<vmem>>, vector<98x512xf32>
    tpu.vector_store %arg4[%c0_5, %c0_6], %5 {strides = array<i32>} : memref<98x512xf32, #tpu.memory_space<vmem>>, vector<98x512xf32>,
    return
  }
  func.func @transform_0(%arg0: i32) -> (i32, i32) {
    %c0_i32 = arith.constant 0 : i32
    %c0_i32_0 = arith.constant 0 : i32
    return %arg0, %c0_i32 : i32, i32
  }
  func.func @transform_1(%arg0: i32) -> (i32, i32) {
    %c0_i32 = arith.constant 0 : i32
    %c0_i32_0 = arith.constant 0 : i32
    %c0_i32_1 = arith.constant 0 : i32
    return %c0_i32, %c0_i32_0 : i32, i32
  }
  func.func @transform_2(%arg0: i32) -> (i32, i32) {
    %c0_i32 = arith.constant 0 : i32
    %c0_i32_0 = arith.constant 0 : i32
    %c0_i32_1 = arith.constant 0 : i32
    return %c0_i32, %c0_i32_0 : i32, i32
  }
  func.func @transform_3(%arg0: i32) -> (i32, i32) {
    %c0_i32 = arith.constant 0 : i32
    %c0_i32_0 = arith.constant 0 : i32
    return %arg0, %c0_i32 : i32, i32
  }
}

</mosaic_0001>

<bundles_post_ra>
// kernel: tpu_custom_call.1
= control target key start
LH: loop header
LB: loop body
LE: loop exit
PB: predicated region body
PF: predicated region fallthrough
CT: control target
= control target key end

     0   :  { %8 = vsyncpa [#allocation3], 0  ;;  %s773_s0 = inlined_call_operand.vmem [shape: bf16[98,64], index: 0, kind: input, shape index: {}]   ;;  %s774_s1 = inlined_call_operand.hbm [shape: bf16[64,512], index: 1, kind: input, shape index: {}]   ;;  %s775_s2 = inlined_call_operand.vmem [shape: f32[1,512], index: 2, kind: input, shape index: {}]   ;;  %s776_s3 = inlined_call_operand.hbm [shape: f32[98,512], index: 3, kind: output, shape index: {}]  }
   0x1   :  { %9 = vsyncpa [#allocation4], 0  ;;  %s610_s12 = smov [#allocation2]   ;;  %s562_s16 = scalar_lea.hbm %s774_s1, 2048 }
   0x2   :  { %s17_s13 = sshll.u32 %s610_s12, 4  ;;  %p563_p0 = scmp.ne.s32.totalorder %s774_s1, %s562_s16  ;;  %s18_s13 = int_to_ptr.vmem [resolvable:$true] %s17_s13 }
   0x3   :  { %p566_p1 = scmp.lt.u32.totalorder %s562_s16, %s774_s1 }
   0x5   :  { %p568_p2 = pnand %p566_p1, %p563_p0 }
   0x7   :  { %571 = shalt.err (!%p568_p2)
}
   0x8   :  { %s572_s21 = scalar_lea.vmem %s18_s13, 2048  ;;  %p577_p4 = scmp.lt.s32.totalorder %s18_s13, %s18_s13 }
   0x9   :  { %p573_p3 = scmp.ne.s32.totalorder %s18_s13, %s572_s21  ;;  %p578_p5 = scmp.lt.s32.totalorder %s572_s21, %s572_s21 }
   0xb   :  { %p579_p6 = por %p578_p5, %p577_p4 }
   0xd   :  { %p580_p7 = pnand %p579_p6, %p573_p3 }
   0xf   :  { %583 = shalt.err (!%p580_p7)
}
  0x10   :  { %s611_s22 = smov 256   ;;  %s612_s23 = smov 16  }
  0x11   :  { %23 = dma.hbm_to_vmem [thread:$0]  %s774_s1, 2048, %s18_s13, [#allocation3], %s611_s22, %s611_s22, %s612_s23  }
  0x12   :  { %606 = dma.done.wait [#allocation3], 2048  }
  0x13   :  { %607 = vsyncadd [#allocation3], 4294965248  ;;  %v613_v0 = vmov 0   ;;  %v531_v1 = vld [vmem:[#allocation2 + $0x4] ss:$16 sps:$4 sm:$0xff]   ;;  %v555_v17 = vld [vmem:[%s773_s0] sm:$0xff]   ;;  %v61_v24 = vlaneseq }
  0x14   :  { %248 = vmatprep.mubr.bf16.mxu0 %v613_v0  ;;  %349 = vmatprep.mubr.bf16.mxu1 %v613_v0  ;;  %v533_v2 = vld [vmem:[#allocation2 + $0xc] ss:$16 sps:$4 sm:$0xff]   ;;  %v535_v3 = vld [vmem:[#allocation2] ss:$16 sps:$4 sm:$0xff]   ;;  %v536_v4 = vld [vmem:[#allocation2 + $0x8] ss:$16 sps:$4 sm:$0xff]  }
  0x15   :  { %216 = vmatprep.subr.bf16.mxu0 %v531_v1  ;;  %317 = vmatprep.subr.bf16.mxu1 %v533_v2  ;;  %v537_v5 = vld [vmem:[#allocation2 + $0x24] ss:$16 sps:$4 sm:$0xff]   ;;  %v539_v6 = vld [vmem:[#allocation2 + $0x2c] ss:$16 sps:$4 sm:$0xff]   ;;  %v541_v7 = vld [vmem:[#allocation2 + $0x20] ss:$16 sps:$4 sm:$0xff]  }
  0x16   :  { %217 = vmatpush1.bf16.msra.mxu0 %v535_v3  ;;  %318 = vmatpush1.bf16.msra.mxu1 %v536_v4  ;;  %v542_v8 = vld [vmem:[#allocation2 + $0x28] ss:$16 sps:$4 sm:$0xff]   ;;  %v543_v9 = vld [vmem:[#allocation2 + $0x44] ss:$16 sps:$4 sm:$0xff]   ;;  %v545_v10 = vld [vmem:[#allocation2 + $0x4c] ss:$16 sps:$4 sm:$0xff]  }
  0x17   :  { %218 = vmatprep.subr.bf16.mxu0 %v537_v5  ;;  %319 = vmatprep.subr.bf16.mxu1 %v539_v6  ;;  %v547_v11 = vld [vmem:[#allocation2 + $0x40] ss:$16 sps:$4 sm:$0xff]   ;;  %v548_v12 = vld [vmem:[#allocation2 + $0x48] ss:$16 sps:$4 sm:$0xff]   ;;  %v549_v13 = vld [vmem:[#allocation2 + $0x64] ss:$16 sps:$4 sm:$0xff]  }
  0x18   :  { %v551_v14 = vld [vmem:[#allocation2 + $0x6c] ss:$16 sps:$4 sm:$0xff]   ;;  %v553_v15 = vld [vmem:[#allocation2 + $0x60] ss:$16 sps:$4 sm:$0xff]   ;;  %v554_v16 = vld [vmem:[#allocation2 + $0x68] ss:$16 sps:$4 sm:$0xff]  }
  0x19   :  { %vm194_vm0 = vcmask 523264   ;;  %v556_v18 = vld [vmem:[%s773_s0 + $0x8] sm:$0xff]   ;;  %v557_v19 = vld [vmem:[%s773_s0 + $0x10] sm:$0xff]   ;;  %v558_v20 = vld [vmem:[%s773_s0 + $0x18] sm:$0xff]   ;;  %v62_v25 = vshrl.u32 %v61_v24, 7 }
  0x1a   :  { %219 = vmatpush1.bf16.msra.mxu0 %v541_v7  ;;  %320 = vmatpush1.bf16.msra.mxu1 %v542_v8  ;;  %v559_v21 = vld [vmem:[%s773_s0 + $0x20] sm:$0xff]   ;;  %v560_v22 = vld [vmem:[%s773_s0 + $0x28] sm:$0xff]   ;;  %v561_v23 = vld [vmem:[%s773_s0 + $0x30] ss:$0 sps:$4 sm:$0x11]   ;;  %s614_s0 = smov [#allocation5]  }
  0x1b   :  { %220 = vmatprep.subr.bf16.mxu0 %v543_v9  ;;  %321 = vmatprep.subr.bf16.mxu1 %v545_v10  ;;  %v63_v26 = vsub.s32 0, %v62_v25  ;;  %v71_v27 = vsub.s32 2, %v62_v25  ;;  %v59_v28 = vld [vmem:[%s775_s2] sm:$0xf]  ;;  %v67_v29 = vsub.s32 1, %v62_v25  ;;  %v75_v30 = vsub.s32 3, %v62_v25 }
  0x1c   :  { %s475_s2 = sshll.u32 %s614_s0, 4  ;;  %s476_s2 = int_to_ptr.vmem [resolvable:$true] %s475_s2 }
  0x1d   :  { %v701_v31 = vrot.slane %v59_v28, %v63_v26  ;;  %v703_v32 = vrot.slane %v59_v28, %v71_v27  ;;  %v705_v33 = vrot.slane %v59_v28, %v67_v29  ;;  %v707_v34 = vrot.slane %v59_v28, %v75_v30  ;;  %s584_s14 = scalar_lea.vmem %s476_s2, 6656  ;;  %p589_p9 = scmp.lt.s32.totalorder %s476_s2, %s476_s2 }
  0x1e   :  { %221 = vmatpush1.bf16.msra.mxu0 %v547_v11  ;;  %322 = vmatpush1.bf16.msra.mxu1 %v548_v12  ;;  %p585_p8 = scmp.ne.s32.totalorder %s476_s2, %s584_s14  ;;  %p590_p10 = scmp.lt.s32.totalorder %s584_s14, %s584_s14 }
  0x1f   :  { %222 = vmatprep.subr.bf16.mxu0 %v549_v13  ;;  %323 = vmatprep.subr.bf16.mxu1 %v551_v14 }
  0x20   :  { %p591_p11 = por %p590_p10, %p589_p9 }
  0x22   :  { %223 = vmatpush1.bf16.msra.mxu0 %v553_v15  ;;  %324 = vmatpush1.bf16.msra.mxu1 %v554_v16  ;;  %p592_p12 = pnand %p591_p11, %p585_p8 }
  0x25   :  { %510 = vmatmul.mubr.msk.bf16.vlgmr.msra.gmra.mrb[0].mxu0 %vm194_vm0, %v555_v17  ;;  %517 = vmatmul.mubr.msk.bf16.vlgmr.msra.gmra.mrb[0].mxu1 %vm194_vm0, %v555_v17 }
  0x26   :  { %258 = vmatprep.mubr.bf16.mxu0 %v613_v0  ;;  %359 = vmatprep.mubr.bf16.mxu1 %v613_v0 }
  0x2d   :  { %511 = vmatmul.mubr.msk.bf16.gmra.mrb[4].mxu0 %vm194_vm0, %v556_v18  ;;  %518 = vmatmul.mubr.msk.bf16.gmra.mrb[4].mxu1 %vm194_vm0, %v556_v18 }
  0x2e   :  { %268 = vmatprep.mubr.bf16.mxu0 %v613_v0  ;;  %369 = vmatprep.mubr.bf16.mxu1 %v613_v0 }
  0x35   :  { %512 = vmatmul.mubr.msk.bf16.gmra.mrb[8].mxu0 %vm194_vm0, %v557_v19  ;;  %519 = vmatmul.mubr.msk.bf16.gmra.mrb[8].mxu1 %vm194_vm0, %v557_v19 }
  0x36   :  { %278 = vmatprep.mubr.bf16.mxu0 %v613_v0  ;;  %379 = vmatprep.mubr.bf16.mxu1 %v613_v0 }
  0x3d   :  { %513 = vmatmul.mubr.msk.bf16.gmra.mrb[12].mxu0 %vm194_vm0, %v558_v20  ;;  %520 = vmatmul.mubr.msk.bf16.gmra.mrb[12].mxu1 %vm194_vm0, %v558_v20 }
  0x3e   :  { %288 = vmatprep.mubr.bf16.mxu0 %v613_v0  ;;  %389 = vmatprep.mubr.bf16.mxu1 %v613_v0 }
  0x45   :  { %514 = vmatmul.mubr.msk.bf16.gmra.mrb[16].mxu0 %vm194_vm0, %v559_v21  ;;  %521 = vmatmul.mubr.msk.bf16.gmra.mrb[16].mxu1 %vm194_vm0, %v559_v21 }
  0x46   :  { %298 = vmatprep.mubr.bf16.mxu0 %v613_v0  ;;  %399 = vmatprep.mubr.bf16.mxu1 %v613_v0 }
  0x4d   :  { %515 = vmatmul.mubr.msk.bf16.gmra.mrb[20].mxu0 %vm194_vm0, %v560_v22  ;;  %522 = vmatmul.mubr.msk.bf16.gmra.mrb[20].mxu1 %vm194_vm0, %v560_v22 }
  0x4e   :  { %308 = vmatprep.mubr.bf16.mxu0 %v613_v0  ;;  %409 = vmatprep.mubr.bf16.mxu1 %v613_v0 }
  0x55   :  { %516 = vmatmul.mubr.msk.bf16.gmra.mrb[24].mxu0 %vm194_vm0, %v561_v23  ;;  %523 = vmatmul.mubr.msk.bf16.gmra.mrb[24].mxu1 %vm194_vm0, %v561_v23 }
  0xf8   :  { %v250_v35 = vpop.f32.mrb[0].mxu0  ;;  %v351_v36 = vpop.f32.mrb[0].mxu1 }
  0xf9   :  { %v251_v37 = vadd.f32 %v250_v35, %v701_v31  ;;  %v352_v38 = vadd.f32 %v351_v36, %v703_v32  ;;  %v252_v39 = vpop.f32.mrb[1].mxu0  ;;  %v353_v40 = vpop.f32.mrb[1].mxu1 }
  0xfa   :  { %v253_v41 = vadd.f32 %v252_v39, %v705_v33  ;;  %v354_v42 = vadd.f32 %v353_v40, %v707_v34  ;;  %v254_v43 = vpop.f32.mrb[2].mxu0  ;;  %v355_v44 = vpop.f32.mrb[2].mxu1 }
  0xfb   :  { %418 = vst [vmem:[#allocation5] sm:$0xff] %v251_v37  ;;  %420 = vst [vmem:[#allocation5 + $0x10] sm:$0xff] %v352_v38  ;;  %v255_v45 = vadd.f32 %v254_v43, %v701_v31  ;;  %v356_v46 = vadd.f32 %v355_v44, %v703_v32  ;;  %v256_v47 = vpop.f32.mrb[3].mxu0  ;;  %v357_v48 = vpop.f32.mrb[3].mxu1 }
  0xfc   :  { %419 = vst [vmem:[#allocation5 + $0x8] sm:$0xff] %v253_v41  ;;  %421 = vst [vmem:[#allocation5 + $0x18] sm:$0xff] %v354_v42  ;;  %v257_v49 = vadd.f32 %v256_v47, %v705_v33  ;;  %v358_v50 = vadd.f32 %v357_v48, %v707_v34 }
  0xfd   :  { %422 = vst [vmem:[#allocation5 + $0x20] sm:$0xff] %v255_v45  ;;  %424 = vst [vmem:[#allocation5 + $0x30] sm:$0xff] %v356_v46 }
  0xfe   :  { %423 = vst [vmem:[#allocation5 + $0x28] sm:$0xff] %v257_v49  ;;  %425 = vst [vmem:[#allocation5 + $0x38] sm:$0xff] %v358_v50 }
 0x100   :  { %v260_v51 = vpop.f32.mrb[4].mxu0  ;;  %v361_v52 = vpop.f32.mrb[4].mxu1 }
 0x101   :  { %v261_v53 = vadd.f32 %v260_v51, %v701_v31  ;;  %v362_v54 = vadd.f32 %v361_v52, %v703_v32  ;;  %v262_v55 = vpop.f32.mrb[5].mxu0  ;;  %v363_v56 = vpop.f32.mrb[5].mxu1 }
 0x102   :  { %v263_v57 = vadd.f32 %v262_v55, %v705_v33  ;;  %v364_v58 = vadd.f32 %v363_v56, %v707_v34  ;;  %v264_v59 = vpop.f32.mrb[6].mxu0  ;;  %v365_v60 = vpop.f32.mrb[6].mxu1 }
 0x103   :  { %426 = vst [vmem:[#allocation5 + $0x40] sm:$0xff] %v261_v53  ;;  %428 = vst [vmem:[#allocation5 + $0x50] sm:$0xff] %v362_v54  ;;  %v265_v61 = vadd.f32 %v264_v59, %v701_v31  ;;  %v366_v62 = vadd.f32 %v365_v60, %v703_v32  ;;  %v266_v63 = vpop.f32.mrb[7].mxu0  ;;  %v367_v0 = vpop.f32.mrb[7].mxu1 }
 0x104   :  { %427 = vst [vmem:[#allocation5 + $0x48] sm:$0xff] %v263_v57  ;;  %429 = vst [vmem:[#allocation5 + $0x58] sm:$0xff] %v364_v58  ;;  %v267_v1 = vadd.f32 %v266_v63, %v705_v33  ;;  %v368_v2 = vadd.f32 %v367_v0, %v707_v34 }
 0x105   :  { %430 = vst [vmem:[#allocation5 + $0x60] sm:$0xff] %v265_v61  ;;  %432 = vst [vmem:[#allocation5 + $0x70] sm:$0xff] %v366_v62 }
 0x106   :  { %431 = vst [vmem:[#allocation5 + $0x68] sm:$0xff] %v267_v1  ;;  %433 = vst [vmem:[#allocation5 + $0x78] sm:$0xff] %v368_v2 }
 0x108   :  { %v270_v3 = vpop.f32.mrb[8].mxu0  ;;  %v371_v4 = vpop.f32.mrb[8].mxu1 }
 0x109   :  { %v271_v5 = vadd.f32 %v270_v3, %v701_v31  ;;  %v372_v6 = vadd.f32 %v371_v4, %v703_v32  ;;  %v272_v7 = vpop.f32.mrb[9].mxu0  ;;  %v373_v8 = vpop.f32.mrb[9].mxu1 }
 0x10a   :  { %v273_v9 = vadd.f32 %v272_v7, %v705_v33  ;;  %v374_v10 = vadd.f32 %v373_v8, %v707_v34  ;;  %v274_v11 = vpop.f32.mrb[10].mxu0  ;;  %v375_v12 = vpop.f32.mrb[10].mxu1 }
 0x10b   :  { %434 = vst [vmem:[#allocation5 + $0x80] sm:$0xff] %v271_v5  ;;  %436 = vst [vmem:[#allocation5 + $0x90] sm:$0xff] %v372_v6  ;;  %v275_v13 = vadd.f32 %v274_v11, %v701_v31  ;;  %v376_v14 = vadd.f32 %v375_v12, %v703_v32  ;;  %v276_v15 = vpop.f32.mrb[11].mxu0  ;;  %v377_v16 = vpop.f32.mrb[11].mxu1 }
 0x10c   :  { %435 = vst [vmem:[#allocation5 + $0x88] sm:$0xff] %v273_v9  ;;  %437 = vst [vmem:[#allocation5 + $0x98] sm:$0xff] %v374_v10  ;;  %v277_v17 = vadd.f32 %v276_v15, %v705_v33  ;;  %v378_v18 = vadd.f32 %v377_v16, %v707_v34 }
 0x10d   :  { %438 = vst [vmem:[#allocation5 + $0xa0] sm:$0xff] %v275_v13  ;;  %440 = vst [vmem:[#allocation5 + $0xb0] sm:$0xff] %v376_v14 }
 0x10e   :  { %439 = vst [vmem:[#allocation5 + $0xa8] sm:$0xff] %v277_v17  ;;  %441 = vst [vmem:[#allocation5 + $0xb8] sm:$0xff] %v378_v18 }
 0x110   :  { %v280_v19 = vpop.f32.mrb[12].mxu0  ;;  %v381_v20 = vpop.f32.mrb[12].mxu1 }
 0x111   :  { %v281_v21 = vadd.f32 %v280_v19, %v701_v31  ;;  %v382_v22 = vadd.f32 %v381_v20, %v703_v32  ;;  %v282_v23 = vpop.f32.mrb[13].mxu0  ;;  %v383_v24 = vpop.f32.mrb[13].mxu1 }
 0x112   :  { %v283_v25 = vadd.f32 %v282_v23, %v705_v33  ;;  %v384_v26 = vadd.f32 %v383_v24, %v707_v34  ;;  %v284_v27 = vpop.f32.mrb[14].mxu0  ;;  %v385_v28 = vpop.f32.mrb[14].mxu1 }
 0x113   :  { %442 = vst [vmem:[#allocation5 + $0xc0] sm:$0xff] %v281_v21  ;;  %444 = vst [vmem:[#allocation5 + $0xd0] sm:$0xff] %v382_v22  ;;  %v285_v29 = vadd.f32 %v284_v27, %v701_v31  ;;  %v386_v30 = vadd.f32 %v385_v28, %v703_v32  ;;  %v286_v35 = vpop.f32.mrb[15].mxu0  ;;  %v387_v36 = vpop.f32.mrb[15].mxu1 }
 0x114   :  { %443 = vst [vmem:[#allocation5 + $0xc8] sm:$0xff] %v283_v25  ;;  %445 = vst [vmem:[#allocation5 + $0xd8] sm:$0xff] %v384_v26  ;;  %v287_v37 = vadd.f32 %v286_v35, %v705_v33  ;;  %v388_v38 = vadd.f32 %v387_v36, %v707_v34 }
 0x115   :  { %446 = vst [vmem:[#allocation5 + $0xe0] sm:$0xff] %v285_v29  ;;  %448 = vst [vmem:[#allocation5 + $0xf0] sm:$0xff] %v386_v30 }
 0x116   :  { %447 = vst [vmem:[#allocation5 + $0xe8] sm:$0xff] %v287_v37  ;;  %449 = vst [vmem:[#allocation5 + $0xf8] sm:$0xff] %v388_v38 }
 0x118   :  { %v290_v39 = vpop.f32.mrb[16].mxu0  ;;  %v391_v40 = vpop.f32.mrb[16].mxu1 }
 0x119   :  { %v291_v41 = vadd.f32 %v290_v39, %v701_v31  ;;  %v392_v42 = vadd.f32 %v391_v40, %v703_v32  ;;  %v292_v43 = vpop.f32.mrb[17].mxu0  ;;  %v393_v44 = vpop.f32.mrb[17].mxu1 }
 0x11a   :  { %v293_v45 = vadd.f32 %v292_v43, %v705_v33  ;;  %v394_v46 = vadd.f32 %v393_v44, %v707_v34  ;;  %v294_v47 = vpop.f32.mrb[18].mxu0  ;;  %v395_v48 = vpop.f32.mrb[18].mxu1 }
 0x11b   :  { %450 = vst [vmem:[#allocation5 + $0x100] sm:$0xff] %v291_v41  ;;  %452 = vst [vmem:[#allocation5 + $0x110] sm:$0xff] %v392_v42  ;;  %v295_v49 = vadd.f32 %v294_v47, %v701_v31  ;;  %v396_v50 = vadd.f32 %v395_v48, %v703_v32  ;;  %v296_v51 = vpop.f32.mrb[19].mxu0  ;;  %v397_v52 = vpop.f32.mrb[19].mxu1 }
 0x11c   :  { %451 = vst [vmem:[#allocation5 + $0x108] sm:$0xff] %v293_v45  ;;  %453 = vst [vmem:[#allocation5 + $0x118] sm:$0xff] %v394_v46  ;;  %v297_v53 = vadd.f32 %v296_v51, %v705_v33  ;;  %v398_v54 = vadd.f32 %v397_v52, %v707_v34 }
 0x11d   :  { %454 = vst [vmem:[#allocation5 + $0x120] sm:$0xff] %v295_v49  ;;  %456 = vst [vmem:[#allocation5 + $0x130] sm:$0xff] %v396_v50 }
 0x11e   :  { %455 = vst [vmem:[#allocation5 + $0x128] sm:$0xff] %v297_v53  ;;  %457 = vst [vmem:[#allocation5 + $0x138] sm:$0xff] %v398_v54 }
 0x120   :  { %v300_v55 = vpop.f32.mrb[20].mxu0  ;;  %v401_v56 = vpop.f32.mrb[20].mxu1 }
 0x121   :  { %v301_v57 = vadd.f32 %v300_v55, %v701_v31  ;;  %v402_v58 = vadd.f32 %v401_v56, %v703_v32  ;;  %v302_v59 = vpop.f32.mrb[21].mxu0  ;;  %v403_v60 = vpop.f32.mrb[21].mxu1 }
 0x122   :  { %v303_v61 = vadd.f32 %v302_v59, %v705_v33  ;;  %v404_v62 = vadd.f32 %v403_v60, %v707_v34  ;;  %v304_v63 = vpop.f32.mrb[22].mxu0  ;;  %v405_v0 = vpop.f32.mrb[22].mxu1 }
 0x123   :  { %458 = vst [vmem:[#allocation5 + $0x140] sm:$0xff] %v301_v57  ;;  %460 = vst [vmem:[#allocation5 + $0x150] sm:$0xff] %v402_v58  ;;  %v305_v1 = vadd.f32 %v304_v63, %v701_v31  ;;  %v406_v2 = vadd.f32 %v405_v0, %v703_v32  ;;  %v306_v3 = vpop.f32.mrb[23].mxu0  ;;  %v407_v4 = vpop.f32.mrb[23].mxu1 }
 0x124   :  { %459 = vst [vmem:[#allocation5 + $0x148] sm:$0xff] %v303_v61  ;;  %461 = vst [vmem:[#allocation5 + $0x158] sm:$0xff] %v404_v62  ;;  %v307_v5 = vadd.f32 %v306_v3, %v705_v33  ;;  %v408_v6 = vadd.f32 %v407_v4, %v707_v34 }
 0x125   :  { %462 = vst [vmem:[#allocation5 + $0x160] sm:$0xff] %v305_v1  ;;  %464 = vst [vmem:[#allocation5 + $0x170] sm:$0xff] %v406_v2 }
 0x126   :  { %463 = vst [vmem:[#allocation5 + $0x168] sm:$0xff] %v307_v5  ;;  %465 = vst [vmem:[#allocation5 + $0x178] sm:$0xff] %v408_v6 }
 0x128   :  { %v310_v7 = vpop.f32.mrb[24].mxu0  ;;  %v411_v8 = vpop.f32.mrb[24].mxu1 }
 0x129   :  { %v311_v9 = vadd.f32 %v310_v7, %v701_v31  ;;  %v412_v10 = vadd.f32 %v411_v8, %v703_v32  ;;  %v312_v11 = vpop.f32.mrb[25].mxu0  ;;  %v413_v12 = vpop.f32.mrb[25].mxu1 }
 0x12a   :  { %v313_v13 = vadd.f32 %v312_v11, %v705_v33  ;;  %v414_v14 = vadd.f32 %v413_v12, %v707_v34  ;;  %v314_v15 = vpop.f32.mrb[26].mxu0  ;;  %v415_v16 = vpop.f32.mrb[26].mxu1 }
 0x12b   :  { %466 = vst [vmem:[#allocation5 + $0x180] sm:$0x3] %v311_v9  ;;  %468 = vst [vmem:[#allocation5 + $0x190] sm:$0x3] %v412_v10  ;;  %v315_v17 = vpop.f32.mrb[27].mxu0  ;;  %v416_v18 = vpop.f32.mrb[27].mxu1 }
 0x12c   :  { %467 = vst [vmem:[#allocation5 + $0x188] sm:$0x3] %v313_v13  ;;  %469 = vst [vmem:[#allocation5 + $0x198] sm:$0x3] %v414_v14 }
 0x12d   :  { %595 = shalt.err (!%p592_p12)
}
 0x12e   :  { %s596_s17 = scalar_lea.hbm %s776_s3, 6656 }
 0x12f   :  { %p597_p13 = scmp.ne.s32.totalorder %s776_s3, %s596_s17  ;;  %p600_p0 = scmp.lt.u32.totalorder %s596_s17, %s776_s3 }
 0x131   :  { %p602_p1 = pnand %p600_p0, %p597_p13 }
 0x133   :  { %605 = shalt.err (!%p602_p1)
}
 0x134   :  { %s615_s22 = smov 512   ;;  %s616_s23 = smov 32  }
 0x135   :  { %481 = dma.vmem_to_hbm [thread:$0]  %s476_s2, 6656, %s776_s3, [#allocation4], %s615_s22, %s615_s22, %s616_s23  }
 0x136   :  { %608 = dma.done.wait [#allocation4], 6656  }
 0x137   :  { %609 = vsyncadd [#allocation4], 4294960640 }
 0x138   :  { %485 = vsyncpa [#allocation3], 1 }
 0x139   :  { %486 = vsyncpa [#allocation4], 1 }

</bundles_post_ra>
